<compile_context>
chip_gen: v6e
topology: v6e:2x2x1
jax: 0.10.0
libtpu: 0.0.40
codegen_flags: <defaults>
</compile_context>

<pallas_src>
import functools

import jax
import jax.numpy as jnp
from jax.experimental import pallas as pl
from jax.experimental.pallas import tpu as pltpu


def _round_up(v, m):
    return ((v + m - 1) // m) * m


def _vmem_capacity_bytes():
    # Per-TensorCore VMEM: 128 MiB on v5e/v6e, 64 MiB on v7x.  Conservative fallback.
    try:
        return int(pltpu.get_tpu_info().vmem_capacity_bytes)
    except Exception:
        return 64 * 1024 * 1024


def _block_spec(shape, index_map, *, buffers=None):
    # Resident operands (constant index_map) get buffer_count=1 to avoid a wasted
    # second VMEM buffer; fall back silently if this JAX build lacks pipeline_mode.
    if buffers is not None:
        try:
            return pl.BlockSpec(shape, index_map, pipeline_mode=pl.Buffered(buffers))
        except TypeError:
            pass
    return pl.BlockSpec(shape, index_map)


def _patch_embed_kernel(x_ref, w_ref, b_ref, o_ref):
    # (tile_m, K) bf16 @ (K, E) bf16 -> f32 accumulate on the MXU, add f32 bias,
    # store bf16 (halves writeback traffic).
    acc = jnp.dot(x_ref[...], w_ref[...], preferred_element_type=jnp.float32)
    o_ref[...] = (acc + b_ref[...]).astype(o_ref.dtype)


def patch_embedding(x, weight, bias, *, patch_size, tile_m_target=None):
    """x: (B, C, H, W) f32.  weight: (E, C, p, p).  bias: (E,).
    Returns (B, n_patches, E) bf16, matching PyTorch PatchEmbedding.forward values."""
    B, C, H, W = x.shape
    E = weight.shape[0]
    p = patch_size
    hp, wp = H // p, W // p
    n_patches = hp * wp
    K = C * p * p
    M = B * n_patches

    # --- generation-aware tiling / VMEM budget -------------------------------
    vmem_cap = _vmem_capacity_bytes()
    if tile_m_target is None:
        # Big tiles (better HBM efficiency) on 128 MiB chips; 256 rows already hits
        # the bandwidth roofline on v7x's 3.2 TB/s HBM with only 64 MiB per TC.
        tile_m_target = 512 if vmem_cap >= 96 * 1024 * 1024 else 256

    # Lane-dense padding: contraction dim K and output dim E to multiples of 128.
    K_pad = _round_up(K, 128)
    E_pad = _round_up(E, 128)

    # bf16 packs 16 rows per sublane group -> 16-aligned row tiles (no masked tail loads).
    tile_m = min(_round_up(tile_m_target, 16), _round_up(M, 16))
    n_steps = pl.cdiv(M, tile_m)
    M_pad = n_steps * tile_m

    # --- build GEMM operands (bf16 cast BEFORE pad; skip pads when aligned) ---
    # Unfold NCHW image into (M, K) patch rows.  allow_input_fusion lets XLA fuse this
    # transpose/reshape + cast into the Pallas input DMA rather than materializing it.
    xp = (x.reshape(B, C, hp, p, wp, p)
            .transpose(0, 2, 4, 1, 3, 5)
            .reshape(M, K)
            .astype(jnp.bfloat16))
    if M_pad != M or K_pad != K:
        xp = jnp.pad(xp, ((0, M_pad - M), (0, K_pad - K)))

    w2d = jnp.transpose(weight.reshape(E, K)).astype(jnp.bfloat16)      # (K, E)
    if K_pad != K or E_pad != E:
        w2d = jnp.pad(w2d, ((0, K_pad - K), (0, E_pad - E)))

    b2d = bias.reshape(1, E).astype(jnp.float32)
    if E_pad != E:
        b2d = jnp.pad(b2d, ((0, 0), (0, E_pad - E)))

    # --- VMEM accounting (per-TensorCore; each TC holds its own resident weight) ---
    vmem_est = (2 * tile_m * K_pad * 2        # x tile, bf16, double-buffered
                + 1 * K_pad * E_pad * 2       # weight, bf16, single-buffered resident
                + 1 * E_pad * 4               # bias, f32, resident
                + 2 * tile_m * E_pad * 2)     # out tile, bf16, double-buffered
    vmem_ceiling = min(int(0.70 * vmem_cap), 96 * 1024 * 1024)
    vmem_limit = int(min(max(2 * vmem_est, 16 * 1024 * 1024), vmem_ceiling))

    bytes_accessed = (M_pad * K_pad * 2       # x, bf16
                      + K_pad * E_pad * 2     # weight, bf16
                      + E_pad * 4             # bias, f32
                      + M_pad * E_pad * 2)    # out, bf16
    cost = pl.CostEstimate(flops=2 * M_pad * K_pad * E_pad,
                           transcendentals=0,
                           bytes_accessed=bytes_accessed)

    out = pl.pallas_call(
        _patch_embed_kernel,
        out_shape=jax.ShapeDtypeStruct((M_pad, E_pad), jnp.bfloat16),
        grid_spec=pltpu.PrefetchScalarGridSpec(
            num_scalar_prefetch=0,
            grid=(n_steps,),
            in_specs=[
                pl.BlockSpec((tile_m, K_pad), lambda i: (i, 0)),               # streamed rows
                _block_spec((K_pad, E_pad), lambda i: (0, 0), buffers=1),      # resident weight
                _block_spec((1, E_pad), lambda i: (0, 0), buffers=1),          # resident bias
            ],
            out_specs=pl.BlockSpec((tile_m, E_pad), lambda i: (i, 0)),
        ),
        compiler_params=pltpu.CompilerParams(
            dimension_semantics=("parallel",),        # shards M tiles across both v7x TCs
            vmem_limit_bytes=vmem_limit,
            allow_input_fusion=[True, True, True],    # fuse unfold/cast/pad into input DMA
        ),
        cost_estimate=cost,
    )(xp, w2d, b2d)

    # Drop row padding (contiguous, cheap).  Only slice lanes when E was actually padded —
    # for standard ViT dims (E multiple of 128) this is a no-op; otherwise prefer fusing the
    # slice into the consumer in a full model.
    if M_pad != M:
        out = out[:M]
    if E_pad != E:
        out = out[:, :E]
    return out.reshape(B, n_patches, E)


def _reference(x, weight, bias, patch_size):
    # Pure-JAX reference: conv2d stride=kernel=p, then flatten(2).transpose(1,2).
    y = jax.lax.conv_general_dilated(
        x, weight,
        window_strides=(patch_size, patch_size),
        padding="VALID",
        dimension_numbers=("NCHW", "OIHW", "NCHW"),
    ) + bias.reshape(1, -1, 1, 1)
    B, E, hp, wp = y.shape
    return y.reshape(B, E, hp * wp).transpose(0, 2, 1)


if __name__ == "__main__":
    # Small shapes consistent with the module: img=16, patch=4, C=4, E=32, B=2
    B, C, H, W = 2, 4, 16, 16
    patch_size = 4
    embed_dim = 32

    key = jax.random.PRNGKey(0)
    kx, kw, kb = jax.random.split(key, 3)
    x = jax.random.normal(kx, (B, C, H, W), dtype=jnp.float32)
    # deterministic synthetic parameters (no checkpoint load)
    weight = jax.random.normal(kw, (embed_dim, C, patch_size, patch_size),
                               dtype=jnp.float32) * 0.05
    bias = jax.random.normal(kb, (embed_dim,), dtype=jnp.float32) * 0.01

    # jit so the unfold / cast producers live in the same XLA module as the
    # pallas_call and can be fused into its input DMA.
    fn = jax.jit(functools.partial(patch_embedding, patch_size=patch_size))

    out = fn(x, weight, bias)
    out = jax.block_until_ready(out)

    ref = _reference(x, weight, bias, patch_size)
    assert out.shape == (B, (H // patch_size) * (W // patch_size), embed_dim)
    # bf16 MXU operands + bf16 output vs f32 reference -> loosened tolerance.
    err = float(jnp.max(jnp.abs(out.astype(jnp.float32) - ref)))
    assert jnp.allclose(out.astype(jnp.float32), ref, atol=3e-2, rtol=3e-2), err

    print("KERNEL_OK")
</pallas_src>

<mosaic_0001>
module attributes {stable_mosaic.version = 11 : i64} {
  func.func @_patch_embed_kernel(%arg0: i32, %arg1: memref<32x128xbf16, #tpu.memory_space<vmem>>, %arg2: memref<128x128xbf16, #tpu.memory_space<vmem>>, %arg3: memref<1x128xf32, #tpu.memory_space<vmem>>, %arg4: memref<32x128xbf16, #tpu.memory_space<vmem>>) attributes {dimension_semantics = [#tpu.dimension_semantics<parallel>], iteration_bounds = array<i64: 1>, scalar_prefetch = 0 : i64, scratch_operands = 0 : i64, tpu.core_type = #tpu.core_type<tc>, window_params = [{transform_indices = @transform_0, window_bounds = array<i64: 32, 128>}, {pipeline_mode = #tpu.pipeline_mode<synchronous>, transform_indices = @transform_1, window_bounds = array<i64: 128, 128>}, {pipeline_mode = #tpu.pipeline_mode<synchronous>, transform_indices = @transform_2, window_bounds = array<i64: 1, 128>}, {transform_indices = @transform_3, window_bounds = array<i64: 32, 128>}]} {
    %c0 = arith.constant 0 : index
    %c0_0 = arith.constant 0 : index
    %0 = vector.load %arg1[%c0, %c0_0] : memref<32x128xbf16, #tpu.memory_space<vmem>>, vector<32x128xbf16>
    %c0_1 = arith.constant 0 : index
    %c0_2 = arith.constant 0 : index
    %1 = vector.load %arg2[%c0_1, %c0_2] : memref<128x128xbf16, #tpu.memory_space<vmem>>, vector<128x128xbf16>
    %cst = arith.constant dense<0.000000e+00> : vector<32x128xf32>
    %2 = tpu.matmul %0, %1, %cst {dimension_numbers = #tpu.dot_dimension_numbers<[1], [0], [0], [1], [0, 0, 1, 1], [], []>} : vector<32x128xbf16>, vector<128x128xbf16>, vector<32x128xf32> -> vector<32x128xf32>
    %c0_3 = arith.constant 0 : index
    %c0_4 = arith.constant 0 : index
    %3 = vector.load %arg3[%c0_3, %c0_4] : memref<1x128xf32, #tpu.memory_space<vmem>>, vector<1x128xf32>
    %4 = vector.broadcast %3 : vector<1x128xf32> to vector<32x128xf32>
    %5 = arith.addf %2, %4 : vector<32x128xf32>
    %6 = arith.truncf %5 : vector<32x128xf32> to vector<32x128xbf16>
    %c0_5 = arith.constant 0 : index
    %c0_6 = arith.constant 0 : index
    %7 = vector.load %arg4[%c0_5, %c0_6] : memref<32x128xbf16, #tpu.memory_space<vmem>>, vector<32x128xbf16>
    tpu.vector_store %arg4[%c0_5, %c0_6], %6 {strides = array<i32>} : memref<32x128xbf16, #tpu.memory_space<vmem>>, vector<32x128xbf16>,
    return
  }
  func.func @transform_0(%arg0: i32) -> (i32, i32) {
    %c0_i32 = arith.constant 0 : i32
    %c0_i32_0 = arith.constant 0 : i32
    return %arg0, %c0_i32 : i32, i32
  }
  func.func @transform_1(%arg0: i32) -> (i32, i32) {
    %c0_i32 = arith.constant 0 : i32
    %c0_i32_0 = arith.constant 0 : i32
    %c0_i32_1 = arith.constant 0 : i32
    return %c0_i32, %c0_i32_0 : i32, i32
  }
  func.func @transform_2(%arg0: i32) -> (i32, i32) {
    %c0_i32 = arith.constant 0 : i32
    %c0_i32_0 = arith.constant 0 : i32
    %c0_i32_1 = arith.constant 0 : i32
    return %c0_i32, %c0_i32_0 : i32, i32
  }
  func.func @transform_3(%arg0: i32) -> (i32, i32) {
    %c0_i32 = arith.constant 0 : i32
    %c0_i32_0 = arith.constant 0 : i32
    return %arg0, %c0_i32 : i32, i32
  }
}

</mosaic_0001>

<bundles_post_ra>
// kernel: patch_embedding.2
= control target key start
LH: loop header
LB: loop body
LE: loop exit
PB: predicated region body
PF: predicated region fallthrough
CT: control target
= control target key end

     0   :  { %s738_s0 = inlined_call_operand.vmem [shape: bf16[64,32], index: 0, kind: input, shape index: {}]   ;;  %s739_s1 = inlined_call_operand.<no memory space> [shape: bf16[], index: 1, kind: input, shape index: {}]   ;;  %s740_s2 = inlined_call_operand.vmem [shape: bf16[32,64], index: 2, kind: input, shape index: {}]   ;;  %s741_s3 = inlined_call_operand.vmem [shape: f32[1,32], index: 3, kind: input, shape index: {}]   ;;  %s742_s4 = inlined_call_operand.<no memory space> [shape: f32[], index: 4, kind: input, shape index: {}]   ;;  %s743_s5 = inlined_call_operand.hbm [shape: bf16[32,128], index: 5, kind: output, shape index: {}]  }
   0x1   :  { %v10_v0 = vstv %s739_s1  ;;  %v20_v1 = vstv %s742_s4 }
   0x2   :  { %v11_v2 = vunpack.i.l.bf16 %v10_v0 }
   0x3   :  { %v40_v4 = vlaneseq  ;;  %v535_v5 = vld [vmem:[%s738_s0 + $0x18] sm:$0xff]   ;;  %v533_v6 = vld [vmem:[%s738_s0 + $0x10] sm:$0xff]   ;;  %v531_v7 = vld [vmem:[%s738_s0 + $0x8] sm:$0xff]  }
   0x4   :  { %v559_v3 = vpack.c.bf16 %v11_v2, %v11_v2  ;;  %v265_v8 = vunpack.c.l.bf16 %v535_v5  ;;  %v288_v9 = vunpack.c.h.bf16 %v535_v5  ;;  %v219_v10 = vunpack.c.l.bf16 %v533_v6  ;;  %v127_v12 = vld [vmem:[%s738_s0] sm:$0xff]   ;;  %v528_v14 = vld [vmem:[%s740_s2 + $0x8] sm:$0xff]  }
   0x5   :  { %v242_v11 = vunpack.c.h.bf16 %v533_v6  ;;  %v37_v13 = vld [vmem:[%s740_s2] sm:$0xff]   ;;  %v41_v15 = vand.u32 127, %v40_v4  ;;  %v173_v16 = vunpack.c.l.bf16 %v531_v7  ;;  %v196_v17 = vunpack.c.h.bf16 %v531_v7 }
   0x6   :  { %575 = vst [vmem:[#allocation20 + $0x38] sm:$0xff] %v559_v3   ;;  %560 = vst [vmem:[#allocation20 + $0x20] sm:$0xff] %v559_v3   ;;  %v128_v18 = vunpack.c.l.bf16 %v127_v12 }
   0x7   :  { %565 = vst [vmem:[#allocation20 + $0x28] sm:$0xff] %v559_v3   ;;  %570 = vst [vmem:[#allocation20 + $0x30] sm:$0xff] %v559_v3  }
   0x8   :  { %21 = vsyncpa [#allocation18], 0  ;;  %v150_v19 = vunpack.c.h.bf16 %v127_v12  ;;  %v38_v20 = vunpack.c.l.bf16 %v37_v13  ;;  %v60_v21 = vunpack.c.h.bf16 %v37_v13  ;;  %v83_v22 = vunpack.c.l.bf16 %v528_v14  ;;  %v340_v42 = vld [vmem:[%s741_s3] sm:$0x1]  ;;  %s654_s4 = smov [#allocation17]  }
   0x9   :  { %vm133_vm0 = vcmp.lt.s32.totalorder %v41_v15, 32  ;;  %vm43_vm1 = vcmp.lt.s32.totalorder %v41_v15, 64  ;;  %v106_v23 = vunpack.c.h.bf16 %v528_v14  ;;  %v342_v24 = vshrl.u32 %v40_v4, 7  ;;  %s516_s11 = sshll.u32 %s654_s4, 4  ;;  %s517_s11 = int_to_ptr.vmem [resolvable:$true] %s516_s11 }
   0xa   :  { %v271_v25 = vsel %vm133_vm0, %v265_v8, %v11_v2  ;;  %v294_v26 = vsel %vm133_vm0, %v288_v9, %v11_v2  ;;  %v225_v27 = vsel %vm133_vm0, %v219_v10, %v11_v2  ;;  %v248_v28 = vsel %vm133_vm0, %v242_v11, %v11_v2  ;;  %s631_s12 = scalar_lea.vmem %s517_s11, 256  ;;  %p636_p1 = scmp.lt.s32.totalorder %s517_s11, %s517_s11 }
   0xb   :  { %v653_v29 = vmov 0.0   ;;  %v179_v34 = vsel %vm133_vm0, %v173_v16, %v11_v2  ;;  %v202_v35 = vsel %vm133_vm0, %v196_v17, %v11_v2  ;;  %v134_v36 = vsel %vm133_vm0, %v128_v18, %v11_v2  ;;  %p632_p0 = scmp.ne.s32.totalorder %s517_s11, %s631_s12  ;;  %p637_p2 = scmp.lt.s32.totalorder %s631_s12, %s631_s12 }
   0xc   :  { %v273_v30 = vpack.c.bf16 %v653_v29, %v271_v25  ;;  %v296_v31 = vpack.c.bf16 %v653_v29, %v294_v26  ;;  %v227_v32 = vpack.c.bf16 %v653_v29, %v225_v27  ;;  %v250_v33 = vpack.c.bf16 %v653_v29, %v248_v28 }
   0xd   :  { %v156_v37 = vsel %vm133_vm0, %v150_v19, %v11_v2  ;;  %v181_v38 = vpack.c.bf16 %v653_v29, %v179_v34  ;;  %v204_v39 = vpack.c.bf16 %v653_v29, %v202_v35  ;;  %v135_v40 = vpack.c.bf16 %v653_v29, %v134_v36  ;;  %v621_v43 = vld [vmem:[#allocation20 + $0x38] sm:$0xff]   ;;  %v624_v56 = vld [vmem:[#allocation20 + $0x20] sm:$0xff]   ;;  %p638_p3 = por %p637_p2, %p636_p1 }
   0xe   :  { %276 = vst [vmem:[#allocation20 + $0x18] sm:$0xf] %v273_v30  ;;  %299 = vst [vmem:[#allocation20 + $0x1c] sm:$0xf] %v296_v31  ;;  %v158_v41 = vpack.c.bf16 %v653_v29, %v156_v37  ;;  %v44_v44 = vsel %vm43_vm1, %v38_v20, %v11_v2  ;;  %v66_v45 = vsel %vm43_vm1, %v60_v21, %v11_v2  ;;  %v622_v48 = vld [vmem:[#allocation20 + $0x30] sm:$0xff]   ;;  %597 = vmatprep.subr.bf16.mxu0 %v621_v43  ;;  %v623_v54 = vld [vmem:[#allocation20 + $0x28] sm:$0xff]  }
   0xf   :  { %230 = vst [vmem:[#allocation20 + $0x10] sm:$0xf] %v227_v32  ;;  %253 = vst [vmem:[#allocation20 + $0x14] sm:$0xf] %v250_v33  ;;  %v89_v46 = vsel %vm43_vm1, %v83_v22, %v11_v2  ;;  %v112_v47 = vsel %vm43_vm1, %v106_v23, %v11_v2  ;;  %v45_v49 = vpack.c.bf16 %v653_v29, %v44_v44  ;;  %vm344_vm2 = vcmp.lt.s32.totalorder %v342_v24, 1  ;;  %p639_p4 = pnand %p638_p3, %p632_p0 }
  0x10   :  { %184 = vst [vmem:[#allocation20 + $0x8] sm:$0xf] %v181_v38  ;;  %207 = vst [vmem:[#allocation20 + $0xc] sm:$0xf] %v204_v39  ;;  %v68_v50 = vpack.c.bf16 %v653_v29, %v66_v45  ;;  %v91_v51 = vpack.c.bf16 %v653_v29, %v89_v46  ;;  %v114_v52 = vpack.c.bf16 %v653_v29, %v112_v47  ;;  %598 = vmatpush3.bf16.msra.mxu0 %v621_v43 }
  0x11   :  { %138 = vst [vmem:[#allocation20] sm:$0xf] %v135_v40  ;;  %161 = vst [vmem:[#allocation20 + $0x4] sm:$0xf] %v158_v41  ;;  %v345_v53 = vsel %vm344_vm2, %v340_v42, %v20_v1  ;;  %599 = vmatprep.subr.bf16.mxu0 %v622_v48 }
  0x12   :  { %48 = vst [vmem:[#allocation19] sm:$0xf] %v45_v49  ;;  %71 = vst [vmem:[#allocation19 + $0x4] sm:$0xf] %v68_v50  ;;  %v350_v55 = vsel %vm133_vm0, %v345_v53, %v20_v1 }
  0x13   :  { %94 = vst [vmem:[#allocation19 + $0x8] sm:$0xf] %v91_v51  ;;  %117 = vst [vmem:[#allocation19 + $0xc] sm:$0xf] %v114_v52 }
  0x14   :  { %353 = vst [vmem:[#allocation21] sm:$0x1] %v350_v55  ;;  %600 = vmatpush3.bf16.msra.mxu0 %v622_v48 }
  0x15   :  { %601 = vmatprep.subr.bf16.mxu0 %v623_v54  ;;  %v625_v58 = vld [vmem:[#allocation20 + $0x18] sm:$0xff]  }
  0x16   :  { %v626_v59 = vld [vmem:[#allocation20 + $0x10] sm:$0xff]  }
  0x17   :  { %v627_v60 = vld [vmem:[#allocation20 + $0x8] sm:$0xff]  }
  0x18   :  { %602 = vmatpush3.bf16.msra.mxu0 %v623_v54  ;;  %v628_v61 = vld [vmem:[#allocation20] sm:$0xff]  }
  0x19   :  { %v629_v57 = vld [vmem:[#allocation19] sm:$0xff]   ;;  %603 = vmatprep.subr.bf16.mxu0 %v624_v56 }
  0x1a   :  { %613 = vmatprep.mubr.bf16.mxu0 %v629_v57  ;;  %v630_v62 = vld [vmem:[#allocation19 + $0x8] sm:$0xff]  }
  0x1b   :  { %v537_v0 = vld [vmem:[#allocation21] ss:$0 sm:$0xff] }
  0x1c   :  { %604 = vmatpush3.bf16.msra.mxu0 %v624_v56 }
  0x1d   :  { %605 = vmatprep.subr.bf16.mxu0 %v625_v58 }
  0x20   :  { %606 = vmatpush3.bf16.msra.mxu0 %v625_v58 }
  0x21   :  { %607 = vmatprep.subr.bf16.mxu0 %v626_v59 }
  0x24   :  { %608 = vmatpush3.bf16.msra.mxu0 %v626_v59 }
  0x25   :  { %609 = vmatprep.subr.bf16.mxu0 %v627_v60 }
  0x28   :  { %610 = vmatpush3.bf16.msra.mxu0 %v627_v60 }
  0x29   :  { %611 = vmatprep.subr.bf16.mxu0 %v628_v61 }
  0x2c   :  { %612 = vmatpush3.bf16.msra.mxu0 %v628_v61 }
  0x2f   :  { %614 = vmatmul.mubr.bf16.vlgmr.msra.gmra.mxu0 %v630_v62 }
  0xef   :  { %v615_v63 = vpop.f32.mrf.mxu0 }
  0xf0   :  { %v485_v3 = vadd.f32 %v615_v63, %v537_v0 }
  0xf1   :  { %v476_v1 = vpop.f32.mrf.mxu0 }
  0xf2   :  { %v477_v6 = vadd.f32 %v537_v0, %v476_v1 }
  0xf3   :  { %v616_v2 = vpop.f32.mrf.mxu0 }
  0xf4   :  { %v488_v4 = vadd.f32 %v616_v2, %v537_v0 }
  0xf5   :  { %v479_v5 = vpop.f32.mrf.mxu0 }
  0xf6   :  { %v584_v7 = vpack.c.bf16 %v488_v4, %v485_v3  ;;  %v480_v8 = vadd.f32 %v537_v0, %v479_v5 }
  0xf8   :  { %586 = vst [vmem:[#allocation17 + $0x8] sm:$0xff] %v584_v7   ;;  %v579_v9 = vpack.c.bf16 %v480_v8, %v477_v6 }
  0xfa   :  { %580 = vst [vmem:[#allocation17] sm:$0xff] %v579_v9  }
  0xfb   :  { %642 = shalt.err (!%p639_p4)
}
  0xfc   :  { %s655_s13 = smov 64   ;;  %s656_s14 = smov 4  }
  0xfd   :  { %522 = dma.vmem_to_hbm [thread:$0]  %s517_s11, 256, %s743_s5, [#allocation18], %s655_s13, %s655_s13, %s656_s14  }
  0xfe   :  { %651 = dma.done.wait [#allocation18], 256  }
  0xff   :  { %652 = vsyncadd [#allocation18], 4294967040 }
 0x100   :  { %526 = vsyncpa [#allocation18], 1 }

</bundles_post_ra>
